<compile_context>
chip_gen: v6e
topology: v6e:2x2x1
jax: 0.10.0
libtpu: 0.0.40
codegen_flags: <defaults>
</compile_context>

<pallas_src>
import jax
import jax.numpy as jnp
from jax.experimental import pallas as pl
from jax.experimental.pallas import tpu as pltpu

LANE = 128


def _round_up(x, m):
    return ((x + m - 1) // m) * m


def _leaky_relu(x, slope=0.2):
    return jnp.where(x > 0, x, slope * x)


def discriminator_kernel(x_ref, w1_ref, b1_ref, w2_ref, b2_ref, w3_ref, b3_ref,
                         o_ref):
    """One batch tile of the forward pass.

    x_ref  : (TB, Dp)     bf16 flattened images (feature dim padded to 128k)
    w1_ref : (Dp, 512)    bf16   b1_ref : (1, 512)  f32
    w2_ref : (512, 256)   bf16   b2_ref : (1, 256)  f32
    w3_ref : (256, 128)   bf16 (cols 1..127 zero)   b3_ref : (1, 128) f32
    o_ref  : (TB, 128)    f32 (column 0 is the prediction)
    """
    x = x_ref[...]  # bf16

    # Layer 1: MXU bf16 matmul, f32 accumulate; activation in f32.
    h1 = jnp.dot(x, w1_ref[...], preferred_element_type=jnp.float32) + b1_ref[...]
    h1 = _leaky_relu(h1).astype(jnp.bfloat16)

    # Layer 2.
    h2 = jnp.dot(h1, w2_ref[...], preferred_element_type=jnp.float32) + b2_ref[...]
    h2 = _leaky_relu(h2).astype(jnp.bfloat16)

    # Layer 3: N padded to 128 so the MXU result / store is lane-dense.
    h3 = jnp.dot(h2, w3_ref[...], preferred_element_type=jnp.float32) + b3_ref[...]

    # Sigmoid: exp on the EUP, approx reciprocal also on the EUP slot.
    o_ref[...] = pl.reciprocal(1.0 + jnp.exp(-h3), approx=True).astype(o_ref.dtype)


def init_discriminator_params(key, img_size):
    """Deterministic init mimicking PyTorch's default Linear init
    (uniform(-1/sqrt(fan_in), 1/sqrt(fan_in))). Weights stored as (in, out)."""
    d_in = img_size * img_size
    dims = [(d_in, 512), (512, 256), (256, 1)]
    params = []
    for (fan_in, fan_out) in dims:
        key, kw, kb = jax.random.split(key, 3)
        bound = 1.0 / jnp.sqrt(jnp.float32(fan_in))
        w = jax.random.uniform(kw, (fan_in, fan_out), jnp.float32, -bound, bound)
        b = jax.random.uniform(kb, (1, fan_out), jnp.float32, -bound, bound)
        params.append((w, b))
    return params


def discriminator_forward(input_img, params, *, batch_tile=256):
    """input_img: (B, 1, S, S) NCHW float32 -> (B, 1) prediction in (0, 1)."""
    B = input_img.shape[0]
    x = input_img.reshape(B, -1).astype(jnp.float32)  # flatten like .view(B, -1)
    D = x.shape[1]
    (w1, b1), (w2, b2), (w3, b3) = params
    H1 = w1.shape[1]       # 512
    H2 = w2.shape[1]       # 256
    N_pad = LANE           # lane-dense padded output width

    # Pad the feature dim to a multiple of 128 and the batch to the tile size.
    D_pad = _round_up(D, LANE)
    TB = min(batch_tile, _round_up(B, 8))
    B_pad = _round_up(B, TB)

    # Activations: zero-pad and cast to bf16 (halves the x DMA volume).
    x_p = jnp.pad(x, ((0, B_pad - B), (0, D_pad - D))).astype(jnp.bfloat16)

    # Weights in bf16 for the MXU; biases stay f32 (VPU adds in f32).
    w1_p = jnp.pad(w1, ((0, D_pad - D), (0, 0))).astype(jnp.bfloat16)
    w2_p = w2.astype(jnp.bfloat16)
    w3_p = jnp.pad(w3, ((0, 0), (0, N_pad - w3.shape[1]))).astype(jnp.bfloat16)
    b1_p = b1.astype(jnp.float32)
    b2_p = b2.astype(jnp.float32)
    b3_p = jnp.pad(b3, ((0, 0), (0, N_pad - b3.shape[1]))).astype(jnp.float32)

    grid = (B_pad // TB,)

    flops = 2 * B_pad * (D_pad * H1 + H1 * H2 + H2 * N_pad)
    bytes_accessed = (x_p.size * 2 + w1_p.size * 2 + w2_p.size * 2 + w3_p.size * 2
                      + (b1_p.size + b2_p.size + b3_p.size) * 4
                      + B_pad * N_pad * 4)

    out = pl.pallas_call(
        discriminator_kernel,
        out_shape=jax.ShapeDtypeStruct((B_pad, N_pad), jnp.float32),
        grid_spec=pltpu.PrefetchScalarGridSpec(
            num_scalar_prefetch=0,
            grid=grid,
            in_specs=[
                # Streamed batch tile (double-buffered by the Pallas pipeline).
                pl.BlockSpec((TB, D_pad), lambda i: (i, 0)),
                # Weights / biases: constant index_map -> resident across steps.
                pl.BlockSpec((D_pad, H1), lambda i: (0, 0)),
                pl.BlockSpec((1, H1), lambda i: (0, 0)),
                pl.BlockSpec((H1, H2), lambda i: (0, 0)),
                pl.BlockSpec((1, H2), lambda i: (0, 0)),
                pl.BlockSpec((H2, N_pad), lambda i: (0, 0)),
                pl.BlockSpec((1, N_pad), lambda i: (0, 0)),
            ],
            out_specs=pl.BlockSpec((TB, N_pad), lambda i: (i, 0)),
        ),
        compiler_params=pltpu.CompilerParams(
            dimension_semantics=("parallel",)),
        cost_estimate=pl.CostEstimate(
            flops=flops,
            transcendentals=2 * B_pad * N_pad,
            bytes_accessed=bytes_accessed),
    )(x_p, w1_p, b1_p, w2_p, b2_p, w3_p, b3_p)

    # Drop batch padding and the lane padding of the final layer.
    return out[:B, :1]


def discriminator_ref(input_img, params):
    """Pure-JAX f32 reference for correctness checking."""
    B = input_img.shape[0]
    x = input_img.reshape(B, -1)
    (w1, b1), (w2, b2), (w3, b3) = params
    h = x @ w1 + b1
    h = jnp.where(h > 0, h, 0.2 * h)
    h = h @ w2 + b2
    h = jnp.where(h > 0, h, 0.2 * h)
    return jax.nn.sigmoid(h @ w3 + b3)


if __name__ == "__main__":
    key = jax.random.PRNGKey(0)
    k_img, k_param = jax.random.split(key)

    batch = 2
    img_size = 16  # params.img_size -> img_shape = (1, 16, 16), 256 features

    input_img = jax.random.normal(k_img, (batch, 1, img_size, img_size),
                                  dtype=jnp.float32)
    params = init_discriminator_params(k_param, img_size)

    pred = discriminator_forward(input_img, params)
    pred = jax.block_until_ready(pred)

    ref = discriminator_ref(input_img, params)
    assert pred.shape == (batch, 1), pred.shape
    # bf16 MXU matmuls (f32 accumulate) + approx reciprocal -> loose tolerance.
    assert jnp.allclose(pred, ref, atol=2e-2, rtol=2e-2), (pred, ref)

    print("KERNEL_OK")
</pallas_src>

<mosaic_0001>
module attributes {stable_mosaic.version = 11 : i64} {
  func.func @discriminator_kernel(%arg0: i32, %arg1: memref<8x256xbf16, #tpu.memory_space<vmem>>, %arg2: memref<256x512xbf16, #tpu.memory_space<vmem>>, %arg3: memref<1x512xf32, #tpu.memory_space<vmem>>, %arg4: memref<512x256xbf16, #tpu.memory_space<vmem>>, %arg5: memref<1x256xf32, #tpu.memory_space<vmem>>, %arg6: memref<256x128xbf16, #tpu.memory_space<vmem>>, %arg7: memref<1x128xf32, #tpu.memory_space<vmem>>, %arg8: memref<8x128xf32, #tpu.memory_space<vmem>>) attributes {dimension_semantics = [#tpu.dimension_semantics<parallel>], iteration_bounds = array<i64: 1>, scalar_prefetch = 0 : i64, scratch_operands = 0 : i64, tpu.core_type = #tpu.core_type<tc>, window_params = [{transform_indices = @transform_0, window_bounds = array<i64: 8, 256>}, {pipeline_mode = #tpu.pipeline_mode<synchronous>, transform_indices = @transform_1, window_bounds = array<i64: 256, 512>}, {pipeline_mode = #tpu.pipeline_mode<synchronous>, transform_indices = @transform_2, window_bounds = array<i64: 1, 512>}, {pipeline_mode = #tpu.pipeline_mode<synchronous>, transform_indices = @transform_3, window_bounds = array<i64: 512, 256>}, {pipeline_mode = #tpu.pipeline_mode<synchronous>, transform_indices = @transform_4, window_bounds = array<i64: 1, 256>}, {pipeline_mode = #tpu.pipeline_mode<synchronous>, transform_indices = @transform_5, window_bounds = array<i64: 256, 128>}, {pipeline_mode = #tpu.pipeline_mode<synchronous>, transform_indices = @transform_6, window_bounds = array<i64: 1, 128>}, {transform_indices = @transform_7, window_bounds = array<i64: 8, 128>}]} {
    %c0 = arith.constant 0 : index
    %c0_0 = arith.constant 0 : index
    %0 = vector.load %arg1[%c0, %c0_0] : memref<8x256xbf16, #tpu.memory_space<vmem>>, vector<8x256xbf16>
    %c0_1 = arith.constant 0 : index
    %c0_2 = arith.constant 0 : index
    %1 = vector.load %arg2[%c0_1, %c0_2] : memref<256x512xbf16, #tpu.memory_space<vmem>>, vector<256x512xbf16>
    %cst = arith.constant dense<0.000000e+00> : vector<8x512xf32>
    %2 = tpu.matmul %0, %1, %cst {dimension_numbers = #tpu.dot_dimension_numbers<[1], [0], [0], [1], [0, 0, 1, 1], [], []>} : vector<8x256xbf16>, vector<256x512xbf16>, vector<8x512xf32> -> vector<8x512xf32>
    %c0_3 = arith.constant 0 : index
    %c0_4 = arith.constant 0 : index
    %3 = vector.load %arg3[%c0_3, %c0_4] : memref<1x512xf32, #tpu.memory_space<vmem>>, vector<1x512xf32>
    %4 = vector.broadcast %3 : vector<1x512xf32> to vector<8x512xf32>
    %5 = arith.addf %2, %4 : vector<8x512xf32>
    %cst_5 = arith.constant 0.000000e+00 : f32
    %6 = vector.broadcast %cst_5 : f32 to vector<8x512xf32>
    %7 = arith.cmpf ogt, %5, %6 : vector<8x512xf32>
    %cst_6 = arith.constant 2.000000e-01 : f32
    %8 = vector.broadcast %cst_6 : f32 to vector<8x512xf32>
    %9 = arith.mulf %8, %5 : vector<8x512xf32>
    %10 = arith.select %7, %5, %9 : vector<8x512xi1>, vector<8x512xf32>
    %11 = arith.truncf %10 : vector<8x512xf32> to vector<8x512xbf16>
    %c0_7 = arith.constant 0 : index
    %c0_8 = arith.constant 0 : index
    %12 = vector.load %arg4[%c0_7, %c0_8] : memref<512x256xbf16, #tpu.memory_space<vmem>>, vector<512x256xbf16>
    %cst_9 = arith.constant dense<0.000000e+00> : vector<8x256xf32>
    %13 = tpu.matmul %11, %12, %cst_9 {dimension_numbers = #tpu.dot_dimension_numbers<[1], [0], [0], [1], [0, 0, 1, 1], [], []>} : vector<8x512xbf16>, vector<512x256xbf16>, vector<8x256xf32> -> vector<8x256xf32>
    %c0_10 = arith.constant 0 : index
    %c0_11 = arith.constant 0 : index
    %14 = vector.load %arg5[%c0_10, %c0_11] : memref<1x256xf32, #tpu.memory_space<vmem>>, vector<1x256xf32>
    %15 = vector.broadcast %14 : vector<1x256xf32> to vector<8x256xf32>
    %16 = arith.addf %13, %15 : vector<8x256xf32>
    %cst_12 = arith.constant 0.000000e+00 : f32
    %17 = vector.broadcast %cst_12 : f32 to vector<8x256xf32>
    %18 = arith.cmpf ogt, %16, %17 : vector<8x256xf32>
    %cst_13 = arith.constant 2.000000e-01 : f32
    %19 = vector.broadcast %cst_13 : f32 to vector<8x256xf32>
    %20 = arith.mulf %19, %16 : vector<8x256xf32>
    %21 = arith.select %18, %16, %20 : vector<8x256xi1>, vector<8x256xf32>
    %22 = arith.truncf %21 : vector<8x256xf32> to vector<8x256xbf16>
    %c0_14 = arith.constant 0 : index
    %c0_15 = arith.constant 0 : index
    %23 = vector.load %arg6[%c0_14, %c0_15] : memref<256x128xbf16, #tpu.memory_space<vmem>>, vector<256x128xbf16>
    %cst_16 = arith.constant dense<0.000000e+00> : vector<8x128xf32>
    %24 = tpu.matmul %22, %23, %cst_16 {dimension_numbers = #tpu.dot_dimension_numbers<[1], [0], [0], [1], [0, 0, 1, 1], [], []>} : vector<8x256xbf16>, vector<256x128xbf16>, vector<8x128xf32> -> vector<8x128xf32>
    %c0_17 = arith.constant 0 : index
    %c0_18 = arith.constant 0 : index
    %25 = vector.load %arg7[%c0_17, %c0_18] : memref<1x128xf32, #tpu.memory_space<vmem>>, vector<1x128xf32>
    %26 = vector.broadcast %25 : vector<1x128xf32> to vector<8x128xf32>
    %27 = arith.addf %24, %26 : vector<8x128xf32>
    %cst_19 = arith.constant 0.000000e+00 : f32
    %28 = vector.broadcast %cst_19 : f32 to vector<8x128xf32>
    %29 = arith.subf %28, %27 : vector<8x128xf32>
    %30 = math.exp %29 : vector<8x128xf32>
    %cst_20 = arith.constant 1.000000e+00 : f32
    %31 = vector.broadcast %cst_20 : f32 to vector<8x128xf32>
    %32 = arith.addf %31, %30 : vector<8x128xf32>
    %33 = tpu.reciprocal %32 {approx = true} : vector<8x128xf32> -> vector<8x128xf32>
    %c0_21 = arith.constant 0 : index
    %c0_22 = arith.constant 0 : index
    %34 = vector.load %arg8[%c0_21, %c0_22] : memref<8x128xf32, #tpu.memory_space<vmem>>, vector<8x128xf32>
    tpu.vector_store %arg8[%c0_21, %c0_22], %33 {strides = array<i32>} : memref<8x128xf32, #tpu.memory_space<vmem>>, vector<8x128xf32>,
    return
  }
  func.func @transform_0(%arg0: i32) -> (i32, i32) {
    %c0_i32 = arith.constant 0 : i32
    %c0_i32_0 = arith.constant 0 : i32
    return %arg0, %c0_i32 : i32, i32
  }
  func.func @transform_1(%arg0: i32) -> (i32, i32) {
    %c0_i32 = arith.constant 0 : i32
    %c0_i32_0 = arith.constant 0 : i32
    %c0_i32_1 = arith.constant 0 : i32
    return %c0_i32, %c0_i32_0 : i32, i32
  }
  func.func @transform_2(%arg0: i32) -> (i32, i32) {
    %c0_i32 = arith.constant 0 : i32
    %c0_i32_0 = arith.constant 0 : i32
    %c0_i32_1 = arith.constant 0 : i32
    return %c0_i32, %c0_i32_0 : i32, i32
  }
  func.func @transform_3(%arg0: i32) -> (i32, i32) {
    %c0_i32 = arith.constant 0 : i32
    %c0_i32_0 = arith.constant 0 : i32
    %c0_i32_1 = arith.constant 0 : i32
    return %c0_i32, %c0_i32_0 : i32, i32
  }
  func.func @transform_4(%arg0: i32) -> (i32, i32) {
    %c0_i32 = arith.constant 0 : i32
    %c0_i32_0 = arith.constant 0 : i32
    %c0_i32_1 = arith.constant 0 : i32
    return %c0_i32, %c0_i32_0 : i32, i32
  }
  func.func @transform_5(%arg0: i32) -> (i32, i32) {
    %c0_i32 = arith.constant 0 : i32
    %c0_i32_0 = arith.constant 0 : i32
    %c0_i32_1 = arith.constant 0 : i32
    return %c0_i32, %c0_i32_0 : i32, i32
  }
  func.func @transform_6(%arg0: i32) -> (i32, i32) {
    %c0_i32 = arith.constant 0 : i32
    %c0_i32_0 = arith.constant 0 : i32
    %c0_i32_1 = arith.constant 0 : i32
    return %c0_i32, %c0_i32_0 : i32, i32
  }
  func.func @transform_7(%arg0: i32) -> (i32, i32) {
    %c0_i32 = arith.constant 0 : i32
    %c0_i32_0 = arith.constant 0 : i32
    return %arg0, %c0_i32 : i32, i32
  }
}

</mosaic_0001>

<bundles_post_ra>
// kernel: tpu_custom_call.1
= control target key start
LH: loop header
LB: loop body
LE: loop exit
PB: predicated region body
PF: predicated region fallthrough
CT: control target
= control target key end

     0   :  { %12 = vsyncpa [#allocation3], 0  ;;  %s1901_s0 = inlined_call_operand.hbm [shape: bf16[8,256], index: 0, kind: input, shape index: {}]   ;;  %s1902_s1 = inlined_call_operand.hbm [shape: bf16[256,512], index: 1, kind: input, shape index: {}]   ;;  %s1903_s2 = inlined_call_operand.hbm [shape: f32[1,512], index: 2, kind: input, shape index: {}]   ;;  %s1904_s3 = inlined_call_operand.hbm [shape: bf16[512,256], index: 3, kind: input, shape index: {}]   ;;  %s1905_s4 = inlined_call_operand.vmem [shape: f32[1,256], index: 4, kind: input, shape index: {}]   ;;  %s1906_s5 = inlined_call_operand.hbm [shape: bf16[256,128], index: 5, kind: input, shape index: {}]   ;;  %s1907_s6 = inlined_call_operand.vmem [shape: f32[1,128], index: 6, kind: input, shape index: {}]   ;;  %s1908_s7 = inlined_call_operand.hbm [shape: f32[8,128], index: 7, kind: output, shape index: {}]  }
   0x1   :  { %13 = vsyncpa [#allocation6], 0 }
   0x2   :  { %14 = vsyncpa [#allocation9], 0 }
   0x3   :  { %15 = vsyncpa [#allocation4], 0  ;;  %s1811_s24 = smov [#allocation5]  }
   0x4   :  { %s31_s25 = sshll.u32 %s1811_s24, 4  ;;  %s32_s25 = int_to_ptr.vmem [resolvable:$true] %s31_s25 }
   0x5   :  { %s1691_s26 = scalar_lea.vmem %s32_s25, 8192  ;;  %p1696_p1 = scmp.lt.s32.totalorder %s32_s25, %s32_s25 }
   0x6   :  { %p1692_p0 = scmp.ne.s32.totalorder %s32_s25, %s1691_s26  ;;  %p1697_p2 = scmp.lt.s32.totalorder %s1691_s26, %s1691_s26 }
   0x8   :  { %p1698_p3 = por %p1697_p2, %p1696_p1 }
   0xa   :  { %p1699_p4 = pnand %p1698_p3, %p1692_p0 }
   0xc   :  { %1702 = shalt.err (!%p1699_p4)
}
   0xd   :  { %s1812_s27 = smov 256   ;;  %s1813_s28 = smov 16  }
   0xe   :  { %37 = dma.hbm_to_vmem [thread:$0]  %s1902_s1, 8192, %s32_s25, [#allocation6], %s1812_s27, %s1812_s27, %s1813_s28  }
   0xf   :  { %s1814_s8 = smov [#allocation8]  }
  0x10   :  { %s53_s9 = sshll.u32 %s1814_s8, 4  ;;  %s54_s9 = int_to_ptr.vmem [resolvable:$true] %s53_s9 }
  0x11   :  { %s1711_s10 = scalar_lea.vmem %s54_s9, 8192  ;;  %p1716_p6 = scmp.lt.s32.totalorder %s54_s9, %s54_s9 }
  0x12   :  { %p1712_p5 = scmp.ne.s32.totalorder %s54_s9, %s1711_s10  ;;  %p1717_p7 = scmp.lt.s32.totalorder %s1711_s10, %s1711_s10 }
  0x14   :  { %p1718_p8 = por %p1717_p7, %p1716_p6 }
  0x16   :  { %p1719_p9 = pnand %p1718_p8, %p1712_p5 }
  0x18   :  { %1722 = shalt.err (!%p1719_p9)
}
  0x19   :  { %s1815_s11 = smov 128   ;;  %s1816_s12 = smov 8  }
  0x1a   :  { %59 = dma.hbm_to_vmem [thread:$0]  %s1904_s3, 8192, %s54_s9, [#allocation9], %s1815_s11, %s1815_s11, %s1816_s12  }
  0x1b   :  { %s1817_s15 = smov [#allocation2]   ;;  %s1818_s17 = smov [#allocation7]  }
  0x1c   :  { %s22_s16 = sshll.u32 %s1817_s15, 4  ;;  %s44_s1 = sshll.u32 %s1818_s17, 4  ;;  %s23_s16 = int_to_ptr.vmem [resolvable:$true] %s22_s16  ;;  %s45_s1 = int_to_ptr.vmem [resolvable:$true] %s44_s1 }
  0x1d   :  { %s1731_s18 = scalar_lea.vmem %s23_s16, 128  ;;  %p1736_p11 = scmp.lt.s32.totalorder %s23_s16, %s23_s16 }
  0x1e   :  { %p1732_p10 = scmp.ne.s32.totalorder %s23_s16, %s1731_s18  ;;  %p1737_p12 = scmp.lt.s32.totalorder %s1731_s18, %s1731_s18 }
  0x20   :  { %p1738_p13 = por %p1737_p12, %p1736_p11 }
  0x22   :  { %p1739_p0 = pnand %p1738_p13, %p1732_p10 }
  0x24   :  { %1742 = shalt.err (!%p1739_p0)
}
  0x25   :  { %25 = dma.hbm_to_vmem [thread:$0]  %s1901_s0, 128, %s23_s16, [#allocation3]  }
  0x26   :  { %s1751_s21 = scalar_lea.vmem %s45_s1, 64  ;;  %p1756_p2 = scmp.lt.s32.totalorder %s45_s1, %s45_s1 }
  0x27   :  { %p1752_p1 = scmp.ne.s32.totalorder %s45_s1, %s1751_s21  ;;  %p1757_p3 = scmp.lt.s32.totalorder %s1751_s21, %s1751_s21 }
  0x29   :  { %p1758_p4 = por %p1757_p3, %p1756_p2 }
  0x2b   :  { %p1759_p5 = pnand %p1758_p4, %p1752_p1 }
  0x2d   :  { %1762 = shalt.err (!%p1759_p5)
}
  0x2e   :  { %47 = dma.hbm_to_vmem [thread:$0]  %s1903_s2, 64, %s45_s1, [#allocation6]  }
  0x2f   :  { %s1819_s23 = smov [#allocation10]  }
  0x30   :  { %s67_s24 = sshll.u32 %s1819_s23, 4  ;;  %s68_s24 = int_to_ptr.vmem [resolvable:$true] %s67_s24 }
  0x31   :  { %s1771_s25 = scalar_lea.vmem %s68_s24, 2048  ;;  %p1776_p7 = scmp.lt.s32.totalorder %s68_s24, %s68_s24 }
  0x32   :  { %p1772_p6 = scmp.ne.s32.totalorder %s68_s24, %s1771_s25  ;;  %p1777_p8 = scmp.lt.s32.totalorder %s1771_s25, %s1771_s25 }
  0x34   :  { %p1778_p9 = por %p1777_p8, %p1776_p7 }
  0x36   :  { %p1779_p10 = pnand %p1778_p9, %p1772_p6 }
  0x38   :  { %1782 = shalt.err (!%p1779_p10)
}
  0x39   :  { %s1820_s0 = smov 64   ;;  %s1821_s26 = smov 4  }
  0x3a   :  { %73 = dma.hbm_to_vmem [thread:$0]  %s1906_s5, 2048, %s68_s24, [#allocation9], %s1820_s0, %s1820_s0, %s1821_s26  }
  0x3b   :  { %1803 = dma.done.wait [#allocation3], 128  }
  0x3c   :  { %1804 = vsyncadd [#allocation3], 4294967168 }
  0x3d   :  { %1805 = dma.done.wait [#allocation6], 8256  }
  0x3e   :  { %1806 = vsyncadd [#allocation6], 4294959040 }
  0x3f   :  { %1807 = dma.done.wait [#allocation9], 10240  }
  0x40   :  { %1808 = vsyncadd [#allocation9], 4294957056  ;;  %v1469_v0 = vld [vmem:[#allocation5 + $0xe4] ss:$16 sps:$4 sm:$0xff]   ;;  %v1471_v1 = vld [vmem:[#allocation5 + $0xec] ss:$16 sps:$4 sm:$0xff]  }
  0x41   :  { %506 = vmatprep.subr.bf16.mxu0 %v1469_v0  ;;  %v1473_v2 = vld [vmem:[#allocation5 + $0xe0] ss:$16 sps:$4 sm:$0xff]   ;;  %v1474_v3 = vld [vmem:[#allocation5 + $0xe8] ss:$16 sps:$4 sm:$0xff]   ;;  %547 = vmatprep.subr.bf16.mxu1 %v1471_v1  ;;  %v1475_v4 = vld [vmem:[#allocation5 + $0xc4] ss:$16 sps:$4 sm:$0xff]  }
  0x42   :  { %507 = vmatpush1.bf16.msra.mxu0 %v1473_v2  ;;  %548 = vmatpush1.bf16.msra.mxu1 %v1474_v3  ;;  %v1477_v5 = vld [vmem:[#allocation5 + $0xcc] ss:$16 sps:$4 sm:$0xff]   ;;  %v1479_v6 = vld [vmem:[#allocation5 + $0xc0] ss:$16 sps:$4 sm:$0xff]   ;;  %v1480_v7 = vld [vmem:[#allocation5 + $0xc8] ss:$16 sps:$4 sm:$0xff]  }
  0x43   :  { %508 = vmatprep.subr.bf16.mxu0 %v1475_v4  ;;  %549 = vmatprep.subr.bf16.mxu1 %v1477_v5  ;;  %v1481_v8 = vld [vmem:[#allocation5 + $0xa4] ss:$16 sps:$4 sm:$0xff]   ;;  %v1483_v9 = vld [vmem:[#allocation5 + $0xac] ss:$16 sps:$4 sm:$0xff]   ;;  %v1485_v10 = vld [vmem:[#allocation5 + $0xa0] ss:$16 sps:$4 sm:$0xff]  }
  0x44   :  { %v1486_v11 = vld [vmem:[#allocation5 + $0xa8] ss:$16 sps:$4 sm:$0xff]   ;;  %v1487_v12 = vld [vmem:[#allocation5 + $0x84] ss:$16 sps:$4 sm:$0xff]   ;;  %v1489_v13 = vld [vmem:[#allocation5 + $0x8c] ss:$16 sps:$4 sm:$0xff]  }
  0x45   :  { %v1491_v14 = vld [vmem:[#allocation5 + $0x80] ss:$16 sps:$4 sm:$0xff]   ;;  %v1492_v15 = vld [vmem:[#allocation5 + $0x88] ss:$16 sps:$4 sm:$0xff]   ;;  %v1493_v16 = vld [vmem:[#allocation5 + $0x64] ss:$16 sps:$4 sm:$0xff]  }
  0x46   :  { %509 = vmatpush1.bf16.msra.mxu0 %v1479_v6  ;;  %550 = vmatpush1.bf16.msra.mxu1 %v1480_v7  ;;  %v1495_v17 = vld [vmem:[#allocation5 + $0x6c] ss:$16 sps:$4 sm:$0xff]   ;;  %v1497_v18 = vld [vmem:[#allocation5 + $0x60] ss:$16 sps:$4 sm:$0xff]   ;;  %v1498_v19 = vld [vmem:[#allocation5 + $0x68] ss:$16 sps:$4 sm:$0xff]  }
  0x47   :  { %510 = vmatprep.subr.bf16.mxu0 %v1481_v8  ;;  %551 = vmatprep.subr.bf16.mxu1 %v1483_v9  ;;  %v1499_v20 = vld [vmem:[#allocation5 + $0x44] ss:$16 sps:$4 sm:$0xff]   ;;  %v1501_v21 = vld [vmem:[#allocation5 + $0x4c] ss:$16 sps:$4 sm:$0xff]   ;;  %v1503_v22 = vld [vmem:[#allocation5 + $0x40] ss:$16 sps:$4 sm:$0xff]  }
  0x48   :  { %v1504_v23 = vld [vmem:[#allocation5 + $0x48] ss:$16 sps:$4 sm:$0xff]   ;;  %v1505_v24 = vld [vmem:[#allocation5 + $0x24] ss:$16 sps:$4 sm:$0xff]   ;;  %v1507_v25 = vld [vmem:[#allocation5 + $0x2c] ss:$16 sps:$4 sm:$0xff]  }
  0x49   :  { %v1509_v26 = vld [vmem:[#allocation5 + $0x20] ss:$16 sps:$4 sm:$0xff]   ;;  %v1510_v27 = vld [vmem:[#allocation5 + $0x28] ss:$16 sps:$4 sm:$0xff]   ;;  %v1511_v28 = vld [vmem:[#allocation5 + $0x4] ss:$16 sps:$4 sm:$0xff]  }
  0x4a   :  { %511 = vmatpush1.bf16.msra.mxu0 %v1485_v10  ;;  %552 = vmatpush1.bf16.msra.mxu1 %v1486_v11  ;;  %v1513_v29 = vld [vmem:[#allocation5 + $0xc] ss:$16 sps:$4 sm:$0xff]   ;;  %v1515_v30 = vld [vmem:[#allocation5] ss:$16 sps:$4 sm:$0xff]   ;;  %v1516_v31 = vld [vmem:[#allocation5 + $0x8] ss:$16 sps:$4 sm:$0xff]  }
  0x4b   :  { %512 = vmatprep.subr.bf16.mxu0 %v1487_v12  ;;  %553 = vmatprep.subr.bf16.mxu1 %v1489_v13  ;;  %v1517_v32 = vld [vmem:[#allocation5 + $0x1e4] ss:$16 sps:$4 sm:$0xff]   ;;  %v1519_v33 = vld [vmem:[#allocation5 + $0x1ec] ss:$16 sps:$4 sm:$0xff]   ;;  %v1521_v34 = vld [vmem:[#allocation5 + $0x1e0] ss:$16 sps:$4 sm:$0xff]  }
  0x4c   :  { %v1522_v35 = vld [vmem:[#allocation5 + $0x1e8] ss:$16 sps:$4 sm:$0xff]   ;;  %v1523_v36 = vld [vmem:[#allocation5 + $0x1c4] ss:$16 sps:$4 sm:$0xff]   ;;  %v1525_v37 = vld [vmem:[#allocation5 + $0x1cc] ss:$16 sps:$4 sm:$0xff]  }
  0x4d   :  { %v1527_v38 = vld [vmem:[#allocation5 + $0x1c0] ss:$16 sps:$4 sm:$0xff]   ;;  %v1528_v39 = vld [vmem:[#allocation5 + $0x1c8] ss:$16 sps:$4 sm:$0xff]   ;;  %v1529_v40 = vld [vmem:[#allocation5 + $0x1a4] ss:$16 sps:$4 sm:$0xff]  }
  0x4e   :  { %513 = vmatpush1.bf16.msra.mxu0 %v1491_v14  ;;  %554 = vmatpush1.bf16.msra.mxu1 %v1492_v15  ;;  %v1531_v41 = vld [vmem:[#allocation5 + $0x1ac] ss:$16 sps:$4 sm:$0xff]   ;;  %v1533_v42 = vld [vmem:[#allocation5 + $0x1a0] ss:$16 sps:$4 sm:$0xff]   ;;  %v1534_v43 = vld [vmem:[#allocation5 + $0x1a8] ss:$16 sps:$4 sm:$0xff]  }
  0x4f   :  { %514 = vmatprep.subr.bf16.mxu0 %v1493_v16  ;;  %555 = vmatprep.subr.bf16.mxu1 %v1495_v17  ;;  %v1535_v44 = vld [vmem:[#allocation5 + $0x184] ss:$16 sps:$4 sm:$0xff]   ;;  %v1537_v45 = vld [vmem:[#allocation5 + $0x18c] ss:$16 sps:$4 sm:$0xff]   ;;  %v1539_v47 = vld [vmem:[#allocation5 + $0x180] ss:$16 sps:$4 sm:$0xff]  }
  0x50   :  { %v92_v46 = vld [vmem:[#allocation2] sm:$0xff]  ;;  %v1541_v50 = vld [vmem:[#allocation5 + $0x164] ss:$16 sps:$4 sm:$0xff]   ;;  %v1545_v52 = vld [vmem:[#allocation5 + $0x160] ss:$16 sps:$4 sm:$0xff]   ;;  %s1822_s30 = smov [#allocation11]  }
  0x51   :  { %v1289_v48 = vcombine.high %v92_v46, %v92_v46  ;;  %v1540_v49 = vld [vmem:[#allocation5 + $0x188] ss:$16 sps:$4 sm:$0xff]   ;;  %v1543_v51 = vld [vmem:[#allocation5 + $0x16c] ss:$16 sps:$4 sm:$0xff]   ;;  %v1547_v54 = vld [vmem:[#allocation5 + $0x144] ss:$16 sps:$4 sm:$0xff]   ;;  %v1288_v4 = vcombine.low %v92_v46, %v92_v46 }
  0x52   :  { %515 = vmatpush1.bf16.msra.mxu0 %v1497_v18  ;;  %556 = vmatpush1.bf16.msra.mxu1 %v1498_v19  ;;  %v1546_v53 = vld [vmem:[#allocation5 + $0x168] ss:$16 sps:$4 sm:$0xff]   ;;  %v1549_v55 = vld [vmem:[#allocation5 + $0x14c] ss:$16 sps:$4 sm:$0xff]   ;;  %v1551_v56 = vld [vmem:[#allocation5 + $0x140] ss:$16 sps:$4 sm:$0xff]  }
  0x53   :  { %516 = vmatprep.subr.bf16.mxu0 %v1499_v20  ;;  %557 = vmatprep.subr.bf16.mxu1 %v1501_v21  ;;  %v1552_v57 = vld [vmem:[#allocation5 + $0x148] ss:$16 sps:$4 sm:$0xff]   ;;  %v1553_v58 = vld [vmem:[#allocation5 + $0x124] ss:$16 sps:$4 sm:$0xff]   ;;  %v1555_v59 = vld [vmem:[#allocation5 + $0x12c] ss:$16 sps:$4 sm:$0xff]  }
  0x54   :  { %538 = vmatprep.mubr.bf16.mxu0 %v1289_v48  ;;  %579 = vmatprep.mubr.bf16.mxu1 %v1289_v48  ;;  %v1557_v60 = vld [vmem:[#allocation5 + $0x120] ss:$16 sps:$4 sm:$0xff]   ;;  %v1558_v61 = vld [vmem:[#allocation5 + $0x128] ss:$16 sps:$4 sm:$0xff]   ;;  %v1559_v62 = vld [vmem:[#allocation5 + $0x104] ss:$16 sps:$4 sm:$0xff]  }
  0x55   :  { %v1561_v63 = vld [vmem:[#allocation5 + $0x10c] ss:$16 sps:$4 sm:$0xff]   ;;  %v1563_v0 = vld [vmem:[#allocation5 + $0x100] ss:$16 sps:$4 sm:$0xff]   ;;  %v1564_v1 = vld [vmem:[#allocation5 + $0x108] ss:$16 sps:$4 sm:$0xff]  }
  0x56   :  { %517 = vmatpush1.bf16.msra.mxu0 %v1503_v22  ;;  %558 = vmatpush1.bf16.msra.mxu1 %v1504_v23  ;;  %v1569_v2 = vld [vmem:[#allocation8 + $0x74] ss:$8 sps:$4 sm:$0xff]   ;;  %v1567_v5 = vld [vmem:[#allocation8 + $0x70] ss:$8 sps:$4 sm:$0xff]   ;;  %v1575_v7 = vld [vmem:[#allocation8 + $0x64] ss:$8 sps:$4 sm:$0xff]  }
  0x57   :  { %518 = vmatprep.subr.bf16.mxu0 %v1505_v24  ;;  %559 = vmatprep.subr.bf16.mxu1 %v1507_v25  ;;  %v1572_v3 = vld [vmem:[#allocation8 + $0x174] ss:$8 sps:$4 sm:$0xff]   ;;  %v1570_v6 = vld [vmem:[#allocation8 + $0x170] ss:$8 sps:$4 sm:$0xff]   ;;  %v1578_v8 = vld [vmem:[#allocation8 + $0x164] ss:$8 sps:$4 sm:$0xff]  }
  0x58   :  { %v1573_v9 = vld [vmem:[#allocation8 + $0x60] ss:$8 sps:$4 sm:$0xff]   ;;  %v1581_v11 = vld [vmem:[#allocation8 + $0x54] ss:$8 sps:$4 sm:$0xff]   ;;  %v1579_v13 = vld [vmem:[#allocation8 + $0x50] ss:$8 sps:$4 sm:$0xff]  }
  0x59   :  { %v1576_v10 = vld [vmem:[#allocation8 + $0x160] ss:$8 sps:$4 sm:$0xff]   ;;  %v1584_v12 = vld [vmem:[#allocation8 + $0x154] ss:$8 sps:$4 sm:$0xff]   ;;  %v1582_v14 = vld [vmem:[#allocation8 + $0x150] ss:$8 sps:$4 sm:$0xff]  }
  0x5a   :  { %519 = vmatpush1.bf16.msra.mxu0 %v1509_v26  ;;  %560 = vmatpush1.bf16.msra.mxu1 %v1510_v27  ;;  %v1587_v15 = vld [vmem:[#allocation8 + $0x44] ss:$8 sps:$4 sm:$0xff]   ;;  %v1585_v17 = vld [vmem:[#allocation8 + $0x40] ss:$8 sps:$4 sm:$0xff]   ;;  %v1593_v19 = vld [vmem:[#allocation8 + $0x34] ss:$8 sps:$4 sm:$0xff]  }
  0x5b   :  { %520 = vmatprep.subr.bf16.mxu0 %v1511_v28  ;;  %561 = vmatprep.subr.bf16.mxu1 %v1513_v29  ;;  %v1590_v16 = vld [vmem:[#allocation8 + $0x144] ss:$8 sps:$4 sm:$0xff]   ;;  %v1588_v18 = vld [vmem:[#allocation8 + $0x140] ss:$8 sps:$4 sm:$0xff]   ;;  %v1596_v20 = vld [vmem:[#allocation8 + $0x134] ss:$8 sps:$4 sm:$0xff]  }
  0x5c   :  { %v1591_v21 = vld [vmem:[#allocation8 + $0x30] ss:$8 sps:$4 sm:$0xff]   ;;  %v1599_v23 = vld [vmem:[#allocation8 + $0x24] ss:$8 sps:$4 sm:$0xff]   ;;  %v1597_v25 = vld [vmem:[#allocation8 + $0x20] ss:$8 sps:$4 sm:$0xff]  }
  0x5d   :  { %v1594_v22 = vld [vmem:[#allocation8 + $0x130] ss:$8 sps:$4 sm:$0xff]   ;;  %v1602_v24 = vld [vmem:[#allocation8 + $0x124] ss:$8 sps:$4 sm:$0xff]   ;;  %v1600_v26 = vld [vmem:[#allocation8 + $0x120] ss:$8 sps:$4 sm:$0xff]  }
  0x5e   :  { %521 = vmatpush1.bf16.msra.mxu0 %v1515_v30  ;;  %562 = vmatpush1.bf16.msra.mxu1 %v1516_v31  ;;  %v1605_v27 = vld [vmem:[#allocation8 + $0x14] ss:$8 sps:$4 sm:$0xff]   ;;  %v1603_v29 = vld [vmem:[#allocation8 + $0x10] ss:$8 sps:$4 sm:$0xff]   ;;  %v1611_v31 = vld [vmem:[#allocation8 + $0x4] ss:$8 sps:$4 sm:$0xff]  }
  0x5f   :  { %522 = vmatprep.subr.bf16.mxu0 %v1517_v32  ;;  %563 = vmatprep.subr.bf16.mxu1 %v1519_v33  ;;  %v1608_v28 = vld [vmem:[#allocation8 + $0x114] ss:$8 sps:$4 sm:$0xff]   ;;  %v1606_v30 = vld [vmem:[#allocation8 + $0x110] ss:$8 sps:$4 sm:$0xff]   ;;  %v1614_v32 = vld [vmem:[#allocation8 + $0x104] ss:$8 sps:$4 sm:$0xff]  }
  0x60   :  { %v1609_v33 = vld [vmem:[#allocation8] ss:$8 sps:$4 sm:$0xff]   ;;  %v1630_v46 = vld [vmem:[#allocation8 + $0x1d0] ss:$8 sps:$4 sm:$0xff]   ;;  %v1638_v48 = vld [vmem:[#allocation8 + $0x1c4] ss:$8 sps:$4 sm:$0xff]  }
  0x61   :  { %s1277_s8 = sshll.u32 %s1822_s30, 4  ;;  %s1278_s8 = int_to_ptr.vmem [resolvable:$true] %s1277_s8 }
  0x62   :  { %523 = vmatpush2.bf16.msra.mxu0 %v1521_v34  ;;  %564 = vmatpush2.bf16.msra.mxu1 %v1522_v35  ;;  %v1612_v34 = vld [vmem:[#allocation8 + $0x100] ss:$8 sps:$4 sm:$0xff]   ;;  %v1617_v35 = vld [vmem:[#allocation8 + $0xf4] ss:$8 sps:$4 sm:$0xff]   ;;  %s1783_s9 = scalar_lea.vmem %s1278_s8, 128  ;;  %p1788_p12 = scmp.lt.s32.totalorder %s1278_s8, %s1278_s8 }
  0x63   :  { %524 = vmatprep.subr.bf16.mxu0 %v1523_v36  ;;  %565 = vmatprep.subr.bf16.mxu1 %v1525_v37  ;;  %v1620_v36 = vld [vmem:[#allocation8 + $0x1f4] ss:$8 sps:$4 sm:$0xff]   ;;  %v1615_v37 = vld [vmem:[#allocation8 + $0xf0] ss:$8 sps:$4 sm:$0xff]   ;;  %p1784_p11 = scmp.ne.s32.totalorder %s1278_s8, %s1783_s9  ;;  %p1789_p13 = scmp.lt.s32.totalorder %s1783_s9, %s1783_s9 }
  0x65   :  { %p1790_p0 = por %p1789_p13, %p1788_p12 }
  0x66   :  { %525 = vmatpush2.bf16.msra.mxu0 %v1527_v38  ;;  %566 = vmatpush2.bf16.msra.mxu1 %v1528_v39  ;;  %v1618_v38 = vld [vmem:[#allocation8 + $0x1f0] ss:$8 sps:$4 sm:$0xff]   ;;  %v1623_v39 = vld [vmem:[#allocation8 + $0xe4] ss:$8 sps:$4 sm:$0xff]  }
  0x67   :  { %526 = vmatprep.subr.bf16.mxu0 %v1529_v40  ;;  %567 = vmatprep.subr.bf16.mxu1 %v1531_v41  ;;  %v1626_v40 = vld [vmem:[#allocation8 + $0x1e4] ss:$8 sps:$4 sm:$0xff]   ;;  %v1621_v41 = vld [vmem:[#allocation8 + $0xe0] ss:$8 sps:$4 sm:$0xff]   ;;  %p1791_p1 = pnand %p1790_p0, %p1784_p11 }
  0x6a   :  { %527 = vmatpush2.bf16.msra.mxu0 %v1533_v42  ;;  %568 = vmatpush2.bf16.msra.mxu1 %v1534_v43  ;;  %v1624_v42 = vld [vmem:[#allocation8 + $0x1e0] ss:$8 sps:$4 sm:$0xff]   ;;  %v1629_v43 = vld [vmem:[#allocation8 + $0xd4] ss:$8 sps:$4 sm:$0xff]  }
  0x6b   :  { %528 = vmatprep.subr.bf16.mxu0 %v1535_v44  ;;  %569 = vmatprep.subr.bf16.mxu1 %v1537_v45  ;;  %v1632_v44 = vld [vmem:[#allocation8 + $0x1d4] ss:$8 sps:$4 sm:$0xff]   ;;  %v1627_v45 = vld [vmem:[#allocation8 + $0xd0] ss:$8 sps:$4 sm:$0xff]  }
  0x6e   :  { %529 = vmatpush2.bf16.msra.mxu0 %v1539_v47  ;;  %570 = vmatpush2.bf16.msra.mxu1 %v1540_v49  ;;  %v1635_v47 = vld [vmem:[#allocation8 + $0xc4] ss:$8 sps:$4 sm:$0xff]   ;;  %v1633_v49 = vld [vmem:[#allocation8 + $0xc0] ss:$8 sps:$4 sm:$0xff]  }
  0x6f   :  { %530 = vmatprep.subr.bf16.mxu0 %v1541_v50  ;;  %571 = vmatprep.subr.bf16.mxu1 %v1543_v51  ;;  %v1636_v50 = vld [vmem:[#allocation8 + $0x1c0] ss:$8 sps:$4 sm:$0xff]   ;;  %v1641_v51 = vld [vmem:[#allocation8 + $0xb4] ss:$8 sps:$4 sm:$0xff]  }
  0x72   :  { %531 = vmatpush2.bf16.msra.mxu0 %v1545_v52  ;;  %572 = vmatpush2.bf16.msra.mxu1 %v1546_v53  ;;  %v1644_v52 = vld [vmem:[#allocation8 + $0x1b4] ss:$8 sps:$4 sm:$0xff]   ;;  %v1639_v53 = vld [vmem:[#allocation8 + $0xb0] ss:$8 sps:$4 sm:$0xff]  }
  0x73   :  { %532 = vmatprep.subr.bf16.mxu0 %v1547_v54  ;;  %573 = vmatprep.subr.bf16.mxu1 %v1549_v55  ;;  %v1642_v54 = vld [vmem:[#allocation8 + $0x1b0] ss:$8 sps:$4 sm:$0xff]   ;;  %v1647_v55 = vld [vmem:[#allocation8 + $0xa4] ss:$8 sps:$4 sm:$0xff]  }
  0x76   :  { %533 = vmatpush2.bf16.msra.mxu0 %v1551_v56  ;;  %574 = vmatpush2.bf16.msra.mxu1 %v1552_v57  ;;  %v1650_v56 = vld [vmem:[#allocation8 + $0x1a4] ss:$8 sps:$4 sm:$0xff]   ;;  %v1645_v57 = vld [vmem:[#allocation8 + $0xa0] ss:$8 sps:$4 sm:$0xff]  }
  0x77   :  { %534 = vmatprep.subr.bf16.mxu0 %v1553_v58  ;;  %575 = vmatprep.subr.bf16.mxu1 %v1555_v59  ;;  %v1648_v58 = vld [vmem:[#allocation8 + $0x1a0] ss:$8 sps:$4 sm:$0xff]   ;;  %v1653_v59 = vld [vmem:[#allocation8 + $0x94] ss:$8 sps:$4 sm:$0xff]  }
  0x7a   :  { %535 = vmatpush2.bf16.msra.mxu0 %v1557_v60  ;;  %576 = vmatpush2.bf16.msra.mxu1 %v1558_v61  ;;  %v1656_v60 = vld [vmem:[#allocation8 + $0x194] ss:$8 sps:$4 sm:$0xff]   ;;  %v1651_v61 = vld [vmem:[#allocation8 + $0x90] ss:$8 sps:$4 sm:$0xff]  }
  0x7b   :  { %536 = vmatprep.subr.bf16.mxu0 %v1559_v62  ;;  %577 = vmatprep.subr.bf16.mxu1 %v1561_v63  ;;  %v1654_v62 = vld [vmem:[#allocation8 + $0x190] ss:$8 sps:$4 sm:$0xff]   ;;  %v1657_v63 = vld [vmem:[#allocation8 + $0x80] ss:$8 sps:$4 sm:$0xff]  }
  0x7e   :  { %537 = vmatpush2.bf16.msra.mxu0 %v1563_v0  ;;  %578 = vmatpush2.bf16.msra.mxu1 %v1564_v1  ;;  %v1659_v0 = vld [vmem:[#allocation8 + $0x84] ss:$8 sps:$4 sm:$0xff]   ;;  %v1660_v1 = vld [vmem:[#allocation8 + $0x180] ss:$8 sps:$4 sm:$0xff]  }
  0x7f   :  { %1000 = vmatprep.subr.bf16.mxu0 %v1569_v2  ;;  %1041 = vmatprep.subr.bf16.mxu1 %v1572_v3  ;;  %v1662_v2 = vld [vmem:[#allocation8 + $0x184] ss:$8 sps:$4 sm:$0xff]   ;;  %v1663_v3 = vld [vmem:[#allocation10 + $0x78] sm:$0xff]  }
  0x81   :  { %539 = vmatmul.mubr.bf16.vlgmr.msra.gmra.mxu0 %v1288_v4  ;;  %580 = vmatmul.mubr.bf16.vlgmr.msra.gmra.mxu1 %v1288_v4  ;;  %v159_v4 = vlaneseq }
  0x82   :  { %1001 = vmatpush1.bf16.msra.mxu0 %v1567_v5  ;;  %1042 = vmatpush1.bf16.msra.mxu1 %v1570_v6 }
  0x83   :  { %1002 = vmatprep.subr.bf16.mxu0 %v1575_v7  ;;  %1043 = vmatprep.subr.bf16.mxu1 %v1578_v8  ;;  %v1878_v5 = vshrl.u32 %v159_v4, 7  ;;  %v157_v8 = vld [vmem:[#allocation7] sm:$0xf] }
  0x85   :  { %v161_v6 = vsub.s32 0, %v1878_v5  ;;  %v169_v7 = vsub.s32 2, %v1878_v5 }
  0x86   :  { %1003 = vmatpush1.bf16.msra.mxu0 %v1573_v9  ;;  %1044 = vmatpush1.bf16.msra.mxu1 %v1576_v10  ;;  %v165_v9 = vsub.s32 1, %v1878_v5  ;;  %v173_v10 = vsub.s32 3, %v1878_v5 }
  0x87   :  { %1004 = vmatprep.subr.bf16.mxu0 %v1581_v11  ;;  %1045 = vmatprep.subr.bf16.mxu1 %v1584_v12  ;;  %v162_v11 = vrot.slane %v157_v8, %v161_v6  ;;  %v170_v12 = vrot.slane %v157_v8, %v169_v7 }
  0x8a   :  { %1005 = vmatpush1.bf16.msra.mxu0 %v1579_v13  ;;  %1046 = vmatpush1.bf16.msra.mxu1 %v1582_v14 }
  0x8b   :  { %1006 = vmatprep.subr.bf16.mxu0 %v1587_v15  ;;  %1047 = vmatprep.subr.bf16.mxu1 %v1590_v16  ;;  %v166_v15 = vrot.slane %v157_v8, %v165_v9  ;;  %v174_v16 = vrot.slane %v157_v8, %v173_v10 }
  0x8e   :  { %1007 = vmatpush1.bf16.msra.mxu0 %v1585_v17  ;;  %1048 = vmatpush1.bf16.msra.mxu1 %v1588_v18 }
  0x8f   :  { %1008 = vmatprep.subr.bf16.mxu0 %v1593_v19  ;;  %1049 = vmatprep.subr.bf16.mxu1 %v1596_v20 }
  0x92   :  { %1009 = vmatpush1.bf16.msra.mxu0 %v1591_v21  ;;  %1050 = vmatpush1.bf16.msra.mxu1 %v1594_v22 }
  0x93   :  { %1010 = vmatprep.subr.bf16.mxu0 %v1599_v23  ;;  %1051 = vmatprep.subr.bf16.mxu1 %v1602_v24 }
  0x96   :  { %1011 = vmatpush1.bf16.msra.mxu0 %v1597_v25  ;;  %1052 = vmatpush1.bf16.msra.mxu1 %v1600_v26 }
  0x97   :  { %1012 = vmatprep.subr.bf16.mxu0 %v1605_v27  ;;  %1053 = vmatprep.subr.bf16.mxu1 %v1608_v28 }
  0x9a   :  { %1013 = vmatpush1.bf16.msra.mxu0 %v1603_v29  ;;  %1054 = vmatpush1.bf16.msra.mxu1 %v1606_v30 }
  0x9b   :  { %1014 = vmatprep.subr.bf16.mxu0 %v1611_v31  ;;  %1055 = vmatprep.subr.bf16.mxu1 %v1614_v32 }
  0x9e   :  { %1015 = vmatpush1.bf16.msra.mxu0 %v1609_v33  ;;  %1056 = vmatpush1.bf16.msra.mxu1 %v1612_v34 }
  0x9f   :  { %1016 = vmatprep.subr.bf16.mxu0 %v1617_v35  ;;  %1057 = vmatprep.subr.bf16.mxu1 %v1620_v36  ;;  %v1664_v36 = vld [vmem:[#allocation10 + $0x38] sm:$0xff]  }
  0xa2   :  { %1017 = vmatpush2.bf16.msra.mxu0 %v1615_v37  ;;  %1058 = vmatpush2.bf16.msra.mxu1 %v1618_v38 }
  0xa3   :  { %1018 = vmatprep.subr.bf16.mxu0 %v1623_v39  ;;  %1059 = vmatprep.subr.bf16.mxu1 %v1626_v40  ;;  %v1665_v39 = vld [vmem:[#allocation10 + $0x70] sm:$0xff]  }
  0xa6   :  { %1019 = vmatpush2.bf16.msra.mxu0 %v1621_v41  ;;  %1060 = vmatpush2.bf16.msra.mxu1 %v1624_v42  ;;  %v1666_v41 = vld [vmem:[#allocation10 + $0x30] sm:$0xff]   ;;  %v1667_v42 = vld [vmem:[#allocation10 + $0x68] sm:$0xff]  }
  0xa7   :  { %1020 = vmatprep.subr.bf16.mxu0 %v1629_v43  ;;  %1061 = vmatprep.subr.bf16.mxu1 %v1632_v44  ;;  %v1668_v43 = vld [vmem:[#allocation10 + $0x28] sm:$0xff]   ;;  %v1669_v44 = vld [vmem:[#allocation10 + $0x60] sm:$0xff]  }
  0xaa   :  { %1021 = vmatpush2.bf16.msra.mxu0 %v1627_v45  ;;  %1062 = vmatpush2.bf16.msra.mxu1 %v1630_v46  ;;  %v1670_v45 = vld [vmem:[#allocation10 + $0x20] sm:$0xff]   ;;  %v1671_v46 = vld [vmem:[#allocation10 + $0x58] sm:$0xff]  }
  0xab   :  { %1022 = vmatprep.subr.bf16.mxu0 %v1635_v47  ;;  %1063 = vmatprep.subr.bf16.mxu1 %v1638_v48  ;;  %v1672_v47 = vld [vmem:[#allocation10 + $0x18] sm:$0xff]   ;;  %v1673_v48 = vld [vmem:[#allocation10 + $0x50] sm:$0xff]  }
  0xae   :  { %1023 = vmatpush2.bf16.msra.mxu0 %v1633_v49  ;;  %1064 = vmatpush2.bf16.msra.mxu1 %v1636_v50  ;;  %v1674_v49 = vld [vmem:[#allocation10 + $0x10] sm:$0xff]   ;;  %v1675_v50 = vld [vmem:[#allocation10 + $0x48] sm:$0xff]  }
  0xaf   :  { %1024 = vmatprep.subr.bf16.mxu0 %v1641_v51  ;;  %1065 = vmatprep.subr.bf16.mxu1 %v1644_v52  ;;  %v1676_v51 = vld [vmem:[#allocation10 + $0x8] sm:$0xff]   ;;  %v1677_v52 = vld [vmem:[#allocation10 + $0x40] sm:$0xff]  }
  0xb2   :  { %1025 = vmatpush2.bf16.msra.mxu0 %v1639_v53  ;;  %1066 = vmatpush2.bf16.msra.mxu1 %v1642_v54  ;;  %v1678_v53 = vld [vmem:[#allocation10] sm:$0xff]   ;;  %v668_v54 = vld [vmem:[%s1905_s4] sm:$0x3] }
  0xb3   :  { %1026 = vmatprep.subr.bf16.mxu0 %v1647_v55  ;;  %1067 = vmatprep.subr.bf16.mxu1 %v1650_v56  ;;  %v673_v55 = vrot.slane %v668_v54, %v161_v6  ;;  %v677_v56 = vrot.slane %v668_v54, %v165_v9 }
  0xb6   :  { %1027 = vmatpush2.bf16.msra.mxu0 %v1645_v57  ;;  %1068 = vmatpush2.bf16.msra.mxu1 %v1648_v58 }
  0xb7   :  { %1028 = vmatprep.subr.bf16.mxu0 %v1653_v59  ;;  %1069 = vmatprep.subr.bf16.mxu1 %v1656_v60 }
  0xba   :  { %1029 = vmatpush2.bf16.msra.mxu0 %v1651_v61  ;;  %1070 = vmatpush2.bf16.msra.mxu1 %v1654_v62 }
  0xbb   :  { %1030 = vmatprep.subr.bf16.mxu0 %v1659_v0  ;;  %1071 = vmatprep.subr.bf16.mxu1 %v1662_v2 }
  0xbe   :  { %1031 = vmatpush2.bf16.msra.mxu0 %v1657_v63  ;;  %1072 = vmatpush2.bf16.msra.mxu1 %v1660_v1 }
  0xbf   :  { %1435 = vmatprep.subr.bf16.mxu0 %v1663_v3 }
 0x141   :  { %v540_v13 = vpop.f32.mrf.mxu0  ;;  %v581_v14 = vpop.f32.mrf.mxu1 }
 0x142   :  { %v541_v17 = vadd.f32 %v540_v13, %v162_v11  ;;  %v582_v18 = vadd.f32 %v581_v14, %v170_v12  ;;  %v1418_v12 = vld [vmem:[%s1907_s6] ss:$0 sm:$0xff] }
 0x143   :  { %v542_v19 = vpop.f32.mrf.mxu0  ;;  %v583_v20 = vpop.f32.mrf.mxu1 }
 0x144   :  { %v592_v21 = vmul.f32 0.2, %v541_v17  ;;  %vm588_vm0 = vcmp.gt.f32.partialorder %v541_v17, 0.0  ;;  %v594_v22 = vmul.f32 0.2, %v582_v18  ;;  %v543_v23 = vadd.f32 %v542_v19, %v166_v15 }
 0x145   :  { %v584_v24 = vadd.f32 %v583_v20, %v174_v16  ;;  %v544_v25 = vpop.f32.mrf.mxu0  ;;  %v585_v26 = vpop.f32.mrf.mxu1  ;;  %vm590_vm1 = vcmp.gt.f32.partialorder %v582_v18, 0.0 }
 0x146   :  { %vm589_vm2 = vcmp.gt.f32.partialorder %v543_v23, 0.0  ;;  %v593_v27 = vmul.f32 0.2, %v543_v23  ;;  %v596_v30 = vsel %vm588_vm0, %v541_v17, %v592_v21  ;;  %v598_v32 = vsel %vm590_vm1, %v582_v18, %v594_v22 }
 0x147   :  { %v545_v28 = vpop.f32.mrf.mxu0  ;;  %v586_v29 = vpop.f32.mrf.mxu1  ;;  %vm591_vm3 = vcmp.gt.f32.partialorder %v584_v24, 0.0  ;;  %v595_v31 = vmul.f32 0.2, %v584_v24  ;;  %v600_v37 = vpack.c.bf16 %v596_v30, %v596_v30  ;;  %v602_v40 = vpack.c.bf16 %v598_v32, %v598_v32 }
 0x148   :  { %v597_v33 = vsel %vm589_vm2, %v543_v23, %v593_v27 }
 0x149   :  { %v601_v34 = vpack.c.bf16 %v597_v33, %v597_v33  ;;  %v599_v35 = vsel %vm591_vm3, %v584_v24, %v595_v31 }
 0x14a   :  { %v603_v38 = vpack.c.bf16 %v599_v35, %v599_v35 }
 0x14b   :  { %1032 = vmatprep.mubr.bf16.mxu0 %v601_v34 }
 0x14c   :  { %1073 = vmatprep.mubr.bf16.mxu1 %v603_v38  ;;  %1033 = vmatmul.mubr.bf16.vlgmr.msra.gmra.mxu0 %v600_v37 }
 0x14d   :  { %1074 = vmatmul.mubr.bf16.vlgmr.msra.gmra.mxu1 %v602_v40  ;;  %1436 = vmatpush3.bf16.msra.mxu0 %v1664_v36 }
 0x14e   :  { %1437 = vmatprep.subr.bf16.mxu0 %v1665_v39 }
 0x151   :  { %1438 = vmatpush3.bf16.msra.mxu0 %v1666_v41 }
 0x152   :  { %1439 = vmatprep.subr.bf16.mxu0 %v1667_v42 }
 0x155   :  { %1440 = vmatpush3.bf16.msra.mxu0 %v1668_v43 }
 0x156   :  { %1441 = vmatprep.subr.bf16.mxu0 %v1669_v44 }
 0x159   :  { %1442 = vmatpush3.bf16.msra.mxu0 %v1670_v45 }
 0x15a   :  { %1443 = vmatprep.subr.bf16.mxu0 %v1671_v46 }
 0x15d   :  { %1444 = vmatpush3.bf16.msra.mxu0 %v1672_v47 }
 0x15e   :  { %1445 = vmatprep.subr.bf16.mxu0 %v1673_v48 }
 0x161   :  { %1446 = vmatpush3.bf16.msra.mxu0 %v1674_v49 }
 0x162   :  { %1447 = vmatprep.subr.bf16.mxu0 %v1675_v50 }
 0x165   :  { %1448 = vmatpush3.bf16.msra.mxu0 %v1676_v51 }
 0x166   :  { %1449 = vmatprep.subr.bf16.mxu0 %v1677_v52 }
 0x169   :  { %1450 = vmatpush3.bf16.msra.mxu0 %v1678_v53 }
 0x20c   :  { %v1034_v57 = vpop.f32.mrf.mxu0 }
 0x20d   :  { %v1035_v58 = vadd.f32 %v1034_v57, %v673_v55  ;;  %v1075_v59 = vpop.f32.mrf.mxu1 }
 0x20e   :  { %v1036_v60 = vpop.f32.mrf.mxu0 }
 0x20f   :  { %v1076_v61 = vadd.f32 %v1075_v59, %v1035_v58  ;;  %v1037_v62 = vadd.f32 %v1036_v60, %v677_v56  ;;  %v1077_v63 = vpop.f32.mrf.mxu1 }
 0x210   :  { %v1038_v0 = vpop.f32.mrf.mxu0 }
 0x211   :  { %vm1082_vm4 = vcmp.gt.f32.partialorder %v1076_v61, 0.0  ;;  %v1084_v1 = vmul.f32 0.2, %v1076_v61  ;;  %v1078_v2 = vadd.f32 %v1077_v63, %v1037_v62  ;;  %v1079_v3 = vpop.f32.mrf.mxu1 }
 0x212   :  { %v1039_v4 = vpop.f32.mrf.mxu0 }
 0x213   :  { %vm1083_vm5 = vcmp.gt.f32.partialorder %v1078_v2, 0.0  ;;  %v1085_v7 = vmul.f32 0.2, %v1078_v2  ;;  %v1080_v8 = vpop.f32.mrf.mxu1  ;;  %v1086_v6 = vsel %vm1082_vm4, %v1076_v61, %v1084_v1 }
 0x214   :  { %v1088_v9 = vpack.c.bf16 %v1086_v6, %v1086_v6 }
 0x215   :  { %v1087_v10 = vsel %vm1083_vm5, %v1078_v2, %v1085_v7 }
 0x216   :  { %v1089_v5 = vpack.c.bf16 %v1087_v10, %v1087_v10 }
 0x218   :  { %1257 = vmatprep.mubr.bf16.mxu0 %v1089_v5 }
 0x219   :  { %1258 = vmatmul.mubr.bf16.vlgmr.msra.gmra.mxu0 %v1088_v9 }
 0x2d9   :  { %v1451_v11 = vpop.f32.mrf.mxu0 }
 0x2db   :  { %v1452_v13 = vpop.f32.mrf.mxu0 }
 0x2dc   :  { %v1453_v14 = vadd.f32 %v1452_v13, %v1451_v11 }
 0x2dd   :  { %v1454_v15 = vpop.f32.mrf.mxu0 }
 0x2de   :  { %v1260_v16 = vadd.f32 %v1453_v14, %v1418_v12 }
 0x2df   :  { %v1455_v17 = vpop.f32.mrf.mxu0 }
 0x2e0   :  { %v1265_v18 = vsub.f32 0.0, %v1260_v16 }
 0x2e2   :  { %v1266_v19 = vmul.f32 1.442695, %v1265_v18 }
 0x2e4   :  { %1679 = vpow2.f32 %v1266_v19 }
 0x2f1   :  { %v1680_v20 = vpop.eup %1679 }
 0x2f2   :  { %v1268_v21 = vadd.f32 1.0, %v1680_v20 }
 0x2f4   :  { %1681 = vrcp.f32 %v1268_v21 }
 0x301   :  { %v1682_v22 = vpop.eup %1681 }
 0x302   :  { %1270 = vst [vmem:[#allocation11] sm:$0xff] %v1682_v22 }
 0x303   :  { %1794 = shalt.err (!%p1791_p1)
}
 0x304   :  { %1280 = dma.vmem_to_hbm [thread:$0]  %s1278_s8, 128, %s1908_s7, [#allocation4]  }
 0x305   :  { %1809 = dma.done.wait [#allocation4], 128  }
 0x306   :  { %1810 = vsyncadd [#allocation4], 4294967168 }
 0x307   :  { %1284 = vsyncpa [#allocation3], 1 }
 0x308   :  { %1285 = vsyncpa [#allocation6], 1 }
 0x309   :  { %1286 = vsyncpa [#allocation9], 1 }
 0x30a   :  { %1287 = vsyncpa [#allocation4], 1 }

</bundles_post_ra>
